<compile_context>
chip_gen: v5e
topology: v5e:2x2
jax: 0.10.0
libtpu: 0.0.40
codegen_flags: <defaults>
</compile_context>

<pallas_src>
import jax
import jax.numpy as jnp
from jax import lax
from jax.experimental import pallas as pl
from jax.experimental.pallas import tpu as pltpu

_LOG2_E = 1.4426950408889634  # 1 / ln(2)


def _rse_kernel(a_ref, b_ref, o_ref):
    # a_ref: (TM, D+2) = [log2e*prec*log(b1) | -0.5*log2e*prec*||log b1||^2 | 1]
    # b_ref: (TN, D+2) = [log(b2)            | 1 | -0.5*log2e*prec*||log b2||^2]
    # o_ref: (TM, TN)
    arg = lax.dot_general(
        a_ref[...], b_ref[...],
        dimension_numbers=(((1,), (1,)), ((), ())),
        preferred_element_type=jnp.float32,
    )  # == -0.5 * prec * log2(e) * ||log b1_i - log b2_j||^2   (MXU)
    arg = jnp.minimum(arg, 0.0)          # clamp fp round-off; true arg <= 0
    o_ref[...] = jnp.exp2(arg).astype(o_ref.dtype)   # EUP exp2, cast on store


def _round_up(x, m):
    return ((x + m - 1) // m) * m


def radial_squared_exp_kernel(b1, b2, sigma2_l, *, tm=512, tn=2048,
                              out_dtype=jnp.float32):
    """exp(-0.5/sigma2_l * cdist(log(b1), log(b2), p=2)**2) as a Pallas kernel.

    v5e: keep default tm=512, tn=2048.  v6e/v7x: tn=4096 is a small extra win
    (8 MiB output tile, still within the raised scoped-VMEM limit below).
    Pass out_dtype=jnp.bfloat16 to halve output HBM writeback (opt-in).
    """
    prec_l = 1.0 / float(sigma2_l)
    N1, D = b1.shape
    N2, D2 = b2.shape
    assert D == D2, "feature dims must match"

    # --- wrapper-side precompute (once, not per grid step) -----------------
    lb1 = jnp.log(b1.astype(jnp.float32))                    # (N1, D)
    lb2 = jnp.log(b2.astype(jnp.float32))                    # (N2, D)
    c = prec_l * _LOG2_E                                      # fold prec and log2(e)

    s1 = (-0.5 * c) * jnp.sum(lb1 * lb1, axis=-1, keepdims=True)   # (N1, 1)
    s2 = (-0.5 * c) * jnp.sum(lb2 * lb2, axis=-1, keepdims=True)   # (N2, 1)
    ones1 = jnp.ones((N1, 1), jnp.float32)
    ones2 = jnp.ones((N2, 1), jnp.float32)

    a_aug = jnp.concatenate([c * lb1, s1, ones1], axis=1)    # (N1, D+2)
    b_aug = jnp.concatenate([lb2, ones2, s2], axis=1)        # (N2, D+2)
    daug = D + 2

    # --- tiles / grid: no output padding, Pallas masks ragged edge blocks --
    tm_eff = min(tm, _round_up(N1, 8))      # sublane multiple
    tn_eff = min(tn, _round_up(N2, 128))    # lane multiple (unmasked stores)
    # Row-block axis (i) is the FASTEST grid axis, so the large lb2 tile is
    # the resident one and only the small lb1 tile is refetched per step.
    grid = (pl.cdiv(N2, tn_eff), pl.cdiv(N1, tm_eff))

    out_bytes = int(N1) * int(N2) * jnp.dtype(out_dtype).itemsize
    in_bytes = (int(N1) + int(N2)) * daug * 4
    cost = pl.CostEstimate(
        flops=2 * int(N1) * int(N2) * daug,
        transcendentals=int(N1) * int(N2),
        bytes_accessed=out_bytes + in_bytes,
    )

    return pl.pallas_call(
        _rse_kernel,
        out_shape=jax.ShapeDtypeStruct((N1, N2), out_dtype),
        grid_spec=pltpu.PrefetchScalarGridSpec(
            num_scalar_prefetch=0,
            grid=grid,
            in_specs=[
                pl.BlockSpec((tm_eff, daug), lambda j, i: (i, 0)),
                pl.BlockSpec((tn_eff, daug), lambda j, i: (j, 0)),
            ],
            out_specs=pl.BlockSpec((tm_eff, tn_eff), lambda j, i: (i, j)),
        ),
        compiler_params=pltpu.CompilerParams(
            dimension_semantics=("parallel", "parallel"),
            # Safe on all generations (<= half of v7x physical VMEM); allows
            # tn=4096 tiles on v6e/v7x and raises v5e's 16 MiB scoped default.
            vmem_limit_bytes=32 * 1024 * 1024,
        ),
        cost_estimate=cost,
    )(a_aug, b_aug)


def radial_squared_exp_ref(b1, b2, sigma2_l):
    """Pure-JAX reference (mirrors the PyTorch forward)."""
    prec_l = 1.0 / float(sigma2_l)
    lb1 = jnp.log(b1)
    lb2 = jnp.log(b2)
    diff = lb1[:, None, :] - lb2[None, :, :]
    d2 = jnp.sum(diff * diff, axis=-1)
    return jnp.exp(-0.5 * prec_l * d2)


if __name__ == "__main__":
    key = jax.random.PRNGKey(0)
    k1, k2, k3, k4 = jax.random.split(key, 4)

    # Module hyperparameter (constructor arg), deterministic.
    sigma2_l = 0.5

    # --- Test 1: small aligned shapes (single tile) -------------------------
    N1, N2, D = 256, 128, 32
    b1 = jnp.exp(jax.random.normal(k1, (N1, D), dtype=jnp.float32) * 0.3) + 0.1
    b2 = jnp.exp(jax.random.normal(k2, (N2, D), dtype=jnp.float32) * 0.3) + 0.1

    out = jax.block_until_ready(radial_squared_exp_kernel(b1, b2, sigma2_l))
    ref = radial_squared_exp_ref(b1, b2, sigma2_l)
    assert out.shape == (N1, N2)
    assert jnp.allclose(out, ref, atol=1e-4, rtol=1e-4), (
        f"max abs err {jnp.max(jnp.abs(out - ref))}"
    )

    # --- Test 2: ragged sizes -> multi-block grid with masked edge blocks ---
    M1, M2 = 300, 200
    c1 = jnp.exp(jax.random.normal(k3, (M1, D), dtype=jnp.float32) * 0.3) + 0.1
    c2 = jnp.exp(jax.random.normal(k4, (M2, D), dtype=jnp.float32) * 0.3) + 0.1
    out2 = jax.block_until_ready(
        radial_squared_exp_kernel(c1, c2, sigma2_l, tm=128, tn=128))
    ref2 = radial_squared_exp_ref(c1, c2, sigma2_l)
    assert out2.shape == (M1, M2)
    assert jnp.allclose(out2, ref2, atol=1e-4, rtol=1e-4), (
        f"ragged max abs err {jnp.max(jnp.abs(out2 - ref2))}"
    )

    # --- Test 3: opt-in bf16 output (halves HBM writeback on v5e/v6e) -------
    out_bf16 = jax.block_until_ready(
        radial_squared_exp_kernel(b1, b2, sigma2_l, out_dtype=jnp.bfloat16))
    assert jnp.allclose(out_bf16.astype(jnp.float32), ref, atol=2e-2, rtol=2e-2)

    # TODO(synk): the ||a||^2+||b||^2-2ab expansion loses relative precision on
    # tiny distances (K ~ 1); fine for the forward, but consumers needing
    # accurate (1-K) may want the direct-difference formulation.

    print("KERNEL_OK")
</pallas_src>

<mosaic_0001>
module attributes {stable_mosaic.version = 11 : i64} {
  func.func @_rse_kernel(%arg0: i32, %arg1: i32, %arg2: memref<256x34xf32, #tpu.memory_space<vmem>>, %arg3: memref<128x34xf32, #tpu.memory_space<vmem>>, %arg4: memref<256x128xf32, #tpu.memory_space<vmem>>) attributes {dimension_semantics = [#tpu.dimension_semantics<parallel>, #tpu.dimension_semantics<parallel>], iteration_bounds = array<i64: 1, 1>, scalar_prefetch = 0 : i64, scratch_operands = 0 : i64, tpu.core_type = #tpu.core_type<tc>, window_params = [{transform_indices = @transform_0, window_bounds = array<i64: 256, 34>}, {transform_indices = @transform_1, window_bounds = array<i64: 128, 34>}, {transform_indices = @transform_2, window_bounds = array<i64: 256, 128>}]} {
    %c0 = arith.constant 0 : index
    %c0_0 = arith.constant 0 : index
    %0 = vector.load %arg2[%c0, %c0_0] : memref<256x34xf32, #tpu.memory_space<vmem>>, vector<256x34xf32>
    %c0_1 = arith.constant 0 : index
    %c0_2 = arith.constant 0 : index
    %1 = vector.load %arg3[%c0_1, %c0_2] : memref<128x34xf32, #tpu.memory_space<vmem>>, vector<128x34xf32>
    %cst = arith.constant dense<0.000000e+00> : vector<256x128xf32>
    %2 = tpu.matmul %0, %1, %cst {dimension_numbers = #tpu.dot_dimension_numbers<[1], [1], [0], [0], [0, 0, 1, 0], [], []>} : vector<256x34xf32>, vector<128x34xf32>, vector<256x128xf32> -> vector<256x128xf32>
    %cst_3 = arith.constant 0.000000e+00 : f32
    %3 = vector.broadcast %cst_3 : f32 to vector<256x128xf32>
    %4 = arith.minimumf %2, %3 : vector<256x128xf32>
    %5 = math.exp2 %4 : vector<256x128xf32>
    %c0_4 = arith.constant 0 : index
    %c0_5 = arith.constant 0 : index
    %6 = vector.load %arg4[%c0_4, %c0_5] : memref<256x128xf32, #tpu.memory_space<vmem>>, vector<256x128xf32>
    tpu.vector_store %arg4[%c0_4, %c0_5], %5 {strides = array<i32>} : memref<256x128xf32, #tpu.memory_space<vmem>>, vector<256x128xf32>,
    return
  }
  func.func @transform_0(%arg0: i32, %arg1: i32) -> (i32, i32) {
    %c0_i32 = arith.constant 0 : i32
    %c0_i32_0 = arith.constant 0 : i32
    return %arg1, %c0_i32 : i32, i32
  }
  func.func @transform_1(%arg0: i32, %arg1: i32) -> (i32, i32) {
    %c0_i32 = arith.constant 0 : i32
    %c0_i32_0 = arith.constant 0 : i32
    return %arg0, %c0_i32 : i32, i32
  }
  func.func @transform_2(%arg0: i32, %arg1: i32) -> (i32, i32) {
    %c0_i32 = arith.constant 0 : i32
    return %arg1, %arg0 : i32, i32
  }
}

</mosaic_0001>

<bundles_post_ra>
// kernel: tpu_custom_call.1
= control target key start
LH: loop header
LB: loop body
LE: loop exit
PB: predicated region body
PF: predicated region fallthrough
CT: control target
= control target key end

     0   :  { %vm60_vm0 = vcmask 277504   ;;  %s882_s0 = inlined_call_operand.vmem [shape: f32[256,34], index: 0, kind: input, shape index: {}]   ;;  %s883_s1 = inlined_call_operand.vmem [shape: f32[128,34], index: 1, kind: input, shape index: {}]   ;;  %s884_s2 = inlined_call_operand.hbm [shape: f32[256,128], index: 2, kind: output, shape index: {}]  }
   0x1   :  { %v59_v0 = vld [vmem:[%s883_s1 + $0x78] sm:$0xff]  ;;  %v58_v1 = vld [vmem:[%s883_s1 + $0x70] sm:$0xff] }
   0x2   :  { %481 = vmatpush.xpose.msk.msra.mxu2 %vm60_vm0, %v59_v0  ;;  %482 = vmatpush.xpose.msk.msra.mxu3 %vm60_vm0, %v59_v0 }
   0x3   :  { %432 = vmatpush.xpose.msk.msra.mxu0 %vm60_vm0, %v59_v0  ;;  %480 = vmatpush.xpose.msk.msra.mxu1 %vm60_vm0, %v59_v0 }
   0x4   :  { %7 = vsyncpa [#allocation3], 0  ;;  %v57_v2 = vld [vmem:[%s883_s1 + $0x68] sm:$0xff]  ;;  %v56_v3 = vld [vmem:[%s883_s1 + $0x60] sm:$0xff]  ;;  %s420_s21 = sshll.u32 %s884_s2, 4  ;;  %s622_s22 = smov 128   ;;  %s421_s21 = int_to_ptr.hbm [resolvable:$true] %s420_s21 }
   0x5   :  { %v55_v4 = vld [vmem:[%s883_s1 + $0x58] sm:$0xff]  ;;  %v54_v5 = vld [vmem:[%s883_s1 + $0x50] sm:$0xff]  ;;  %v53_v6 = vld [vmem:[%s883_s1 + $0x48] sm:$0xff]  ;;  %s623_s23 = smov 8  }
   0x6   :  { %484 = vmatpush.xpose.msk.msra.mxu2 %vm60_vm0, %v58_v1  ;;  %485 = vmatpush.xpose.msk.msra.mxu3 %vm60_vm0, %v58_v1  ;;  %v52_v7 = vld [vmem:[%s883_s1 + $0x40] sm:$0xff]  ;;  %v51_v8 = vld [vmem:[%s883_s1 + $0x38] sm:$0xff]  ;;  %v50_v9 = vld [vmem:[%s883_s1 + $0x30] sm:$0xff] }
   0x7   :  { %433 = vmatpush.xpose.msk.msra.mxu0 %vm60_vm0, %v58_v1  ;;  %483 = vmatpush.xpose.msk.msra.mxu1 %vm60_vm0, %v58_v1  ;;  %v49_v10 = vld [vmem:[%s883_s1 + $0x28] sm:$0xff]  ;;  %v48_v11 = vld [vmem:[%s883_s1 + $0x20] sm:$0xff]  ;;  %v47_v12 = vld [vmem:[%s883_s1 + $0x18] sm:$0xff] }
   0x8   :  { %v46_v13 = vld [vmem:[%s883_s1 + $0x10] sm:$0xff]  ;;  %v45_v14 = vld [vmem:[%s883_s1 + $0x8] sm:$0xff]  ;;  %v44_v15 = vld [vmem:[%s883_s1] sm:$0xff] }
   0x9   :  { %v28_v16 = vld [vmem:[%s882_s0 + $0x80] sm:$0xff]  ;;  %v29_v20 = vld [vmem:[%s882_s0 + $0x88] sm:$0xff]  ;;  %v30_v24 = vld [vmem:[%s882_s0 + $0x90] sm:$0xff] }
   0xa   :  { %487 = vmatpush.xpose.msk.msra.mxu2 %vm60_vm0, %v57_v2  ;;  %488 = vmatpush.xpose.msk.msra.mxu3 %vm60_vm0, %v57_v2  ;;  %v36_v17 = vld [vmem:[%s882_s0 + $0xc0] sm:$0xff]  ;;  %v37_v21 = vld [vmem:[%s882_s0 + $0xc8] sm:$0xff]  ;;  %v38_v25 = vld [vmem:[%s882_s0 + $0xd0] sm:$0xff] }
   0xb   :  { %434 = vmatpush.xpose.msk.msra.mxu0 %vm60_vm0, %v57_v2  ;;  %486 = vmatpush.xpose.msk.msra.mxu1 %vm60_vm0, %v57_v2  ;;  %v12_v18 = vld [vmem:[%s882_s0] sm:$0xff]  ;;  %v13_v22 = vld [vmem:[%s882_s0 + $0x8] sm:$0xff]  ;;  %v14_v26 = vld [vmem:[%s882_s0 + $0x10] sm:$0xff] }
   0xc   :  { %v20_v19 = vld [vmem:[%s882_s0 + $0x40] sm:$0xff]  ;;  %v21_v23 = vld [vmem:[%s882_s0 + $0x48] sm:$0xff]  ;;  %v22_v27 = vld [vmem:[%s882_s0 + $0x50] sm:$0xff] }
   0xd   :  { %v31_v28 = vld [vmem:[%s882_s0 + $0x98] sm:$0xff]  ;;  %v32_v32 = vld [vmem:[%s882_s0 + $0xa0] sm:$0xff]  ;;  %v33_v36 = vld [vmem:[%s882_s0 + $0xa8] sm:$0xff] }
   0xe   :  { %490 = vmatpush.xpose.msk.msra.mxu2 %vm60_vm0, %v56_v3  ;;  %491 = vmatpush.xpose.msk.msra.mxu3 %vm60_vm0, %v56_v3  ;;  %v39_v29 = vld [vmem:[%s882_s0 + $0xd8] sm:$0xff]  ;;  %v40_v33 = vld [vmem:[%s882_s0 + $0xe0] sm:$0xff]  ;;  %v41_v37 = vld [vmem:[%s882_s0 + $0xe8] sm:$0xff] }
   0xf   :  { %435 = vmatpush.xpose.msk.msra.mxu0 %vm60_vm0, %v56_v3  ;;  %489 = vmatpush.xpose.msk.msra.mxu1 %vm60_vm0, %v56_v3  ;;  %v15_v30 = vld [vmem:[%s882_s0 + $0x18] sm:$0xff]  ;;  %v16_v34 = vld [vmem:[%s882_s0 + $0x20] sm:$0xff]  ;;  %v17_v38 = vld [vmem:[%s882_s0 + $0x28] sm:$0xff] }
  0x10   :  { %v23_v31 = vld [vmem:[%s882_s0 + $0x58] sm:$0xff]  ;;  %v24_v35 = vld [vmem:[%s882_s0 + $0x60] sm:$0xff]  ;;  %v25_v39 = vld [vmem:[%s882_s0 + $0x68] sm:$0xff] }
  0x11   :  { %v34_v40 = vld [vmem:[%s882_s0 + $0xb0] sm:$0xff]  ;;  %v35_v44 = vld [vmem:[%s882_s0 + $0xb8] sm:$0xff] }
  0x12   :  { %493 = vmatpush.xpose.msk.msra.mxu2 %vm60_vm0, %v55_v4  ;;  %494 = vmatpush.xpose.msk.msra.mxu3 %vm60_vm0, %v55_v4  ;;  %v42_v41 = vld [vmem:[%s882_s0 + $0xf0] sm:$0xff]  ;;  %v43_v45 = vld [vmem:[%s882_s0 + $0xf8] sm:$0xff] }
  0x13   :  { %436 = vmatpush.xpose.msk.msra.mxu0 %vm60_vm0, %v55_v4  ;;  %492 = vmatpush.xpose.msk.msra.mxu1 %vm60_vm0, %v55_v4  ;;  %v18_v42 = vld [vmem:[%s882_s0 + $0x30] sm:$0xff]  ;;  %v19_v46 = vld [vmem:[%s882_s0 + $0x38] sm:$0xff] }
  0x14   :  { %v26_v43 = vld [vmem:[%s882_s0 + $0x70] sm:$0xff]  ;;  %v27_v47 = vld [vmem:[%s882_s0 + $0x78] sm:$0xff]  ;;  %s621_s0 = smov [#allocation2]  }
  0x15   :  { %s418_s18 = sshll.u32 %s621_s0, 4  ;;  %s419_s18 = int_to_ptr.vmem [resolvable:$true] %s418_s18 }
  0x16   :  { %496 = vmatpush.xpose.msk.msra.mxu2 %vm60_vm0, %v54_v5  ;;  %497 = vmatpush.xpose.msk.msra.mxu3 %vm60_vm0, %v54_v5 }
  0x17   :  { %437 = vmatpush.xpose.msk.msra.mxu0 %vm60_vm0, %v54_v5  ;;  %495 = vmatpush.xpose.msk.msra.mxu1 %vm60_vm0, %v54_v5 }
  0x1a   :  { %499 = vmatpush.xpose.msk.msra.mxu2 %vm60_vm0, %v53_v6  ;;  %500 = vmatpush.xpose.msk.msra.mxu3 %vm60_vm0, %v53_v6 }
  0x1b   :  { %438 = vmatpush.xpose.msk.msra.mxu0 %vm60_vm0, %v53_v6  ;;  %498 = vmatpush.xpose.msk.msra.mxu1 %vm60_vm0, %v53_v6 }
  0x1e   :  { %502 = vmatpush.xpose.msk.msra.mxu2 %vm60_vm0, %v52_v7  ;;  %503 = vmatpush.xpose.msk.msra.mxu3 %vm60_vm0, %v52_v7 }
  0x1f   :  { %439 = vmatpush.xpose.msk.msra.mxu0 %vm60_vm0, %v52_v7  ;;  %501 = vmatpush.xpose.msk.msra.mxu1 %vm60_vm0, %v52_v7 }
  0x22   :  { %505 = vmatpush.xpose.msk.msra.mxu2 %vm60_vm0, %v51_v8  ;;  %506 = vmatpush.xpose.msk.msra.mxu3 %vm60_vm0, %v51_v8 }
  0x23   :  { %440 = vmatpush.xpose.msk.msra.mxu0 %vm60_vm0, %v51_v8  ;;  %504 = vmatpush.xpose.msk.msra.mxu1 %vm60_vm0, %v51_v8 }
  0x26   :  { %508 = vmatpush.xpose.msk.msra.mxu2 %vm60_vm0, %v50_v9  ;;  %509 = vmatpush.xpose.msk.msra.mxu3 %vm60_vm0, %v50_v9 }
  0x27   :  { %441 = vmatpush.xpose.msk.msra.mxu0 %vm60_vm0, %v50_v9  ;;  %507 = vmatpush.xpose.msk.msra.mxu1 %vm60_vm0, %v50_v9 }
  0x2a   :  { %511 = vmatpush.xpose.msk.msra.mxu2 %vm60_vm0, %v49_v10  ;;  %512 = vmatpush.xpose.msk.msra.mxu3 %vm60_vm0, %v49_v10 }
  0x2b   :  { %442 = vmatpush.xpose.msk.msra.mxu0 %vm60_vm0, %v49_v10  ;;  %510 = vmatpush.xpose.msk.msra.mxu1 %vm60_vm0, %v49_v10 }
  0x2e   :  { %514 = vmatpush.xpose.msk.msra.mxu2 %vm60_vm0, %v48_v11  ;;  %515 = vmatpush.xpose.msk.msra.mxu3 %vm60_vm0, %v48_v11 }
  0x2f   :  { %443 = vmatpush.xpose.msk.msra.mxu0 %vm60_vm0, %v48_v11  ;;  %513 = vmatpush.xpose.msk.msra.mxu1 %vm60_vm0, %v48_v11 }
  0x32   :  { %517 = vmatpush.xpose.msk.msra.mxu2 %vm60_vm0, %v47_v12  ;;  %518 = vmatpush.xpose.msk.msra.mxu3 %vm60_vm0, %v47_v12 }
  0x33   :  { %444 = vmatpush.xpose.msk.msra.mxu0 %vm60_vm0, %v47_v12  ;;  %516 = vmatpush.xpose.msk.msra.mxu1 %vm60_vm0, %v47_v12 }
  0x36   :  { %520 = vmatpush.xpose.msk.msra.mxu2 %vm60_vm0, %v46_v13  ;;  %521 = vmatpush.xpose.msk.msra.mxu3 %vm60_vm0, %v46_v13 }
  0x37   :  { %445 = vmatpush.xpose.msk.msra.mxu0 %vm60_vm0, %v46_v13  ;;  %519 = vmatpush.xpose.msk.msra.mxu1 %vm60_vm0, %v46_v13 }
  0x3a   :  { %523 = vmatpush.xpose.msk.msra.mxu2 %vm60_vm0, %v45_v14  ;;  %524 = vmatpush.xpose.msk.msra.mxu3 %vm60_vm0, %v45_v14 }
  0x3b   :  { %446 = vmatpush.xpose.msk.msra.mxu0 %vm60_vm0, %v45_v14  ;;  %522 = vmatpush.xpose.msk.msra.mxu1 %vm60_vm0, %v45_v14 }
  0x3e   :  { %526 = vmatpush.xpose.msk.msra.mxu2 %vm60_vm0, %v44_v15  ;;  %527 = vmatpush.xpose.msk.msra.mxu3 %vm60_vm0, %v44_v15 }
  0x3f   :  { %447 = vmatpush.xpose.msk.msra.mxu0 %vm60_vm0, %v44_v15  ;;  %525 = vmatpush.xpose.msk.msra.mxu1 %vm60_vm0, %v44_v15 }
  0x41   :  { %464 = vmatmul.msk.f32.vlgmr.msra.gmra.mxu2 %vm60_vm0, %v28_v16  ;;  %472 = vmatmul.msk.f32.vlgmr.msra.gmra.mxu3 %vm60_vm0, %v36_v17 }
  0x42   :  { %448 = vmatmul.msk.f32.vlgmr.msra.gmra.mxu0 %vm60_vm0, %v12_v18  ;;  %456 = vmatmul.msk.f32.vlgmr.msra.gmra.mxu1 %vm60_vm0, %v20_v19 }
  0x49   :  { %465 = vmatmul.msk.f32.gmra.mxu2 %vm60_vm0, %v29_v20  ;;  %473 = vmatmul.msk.f32.gmra.mxu3 %vm60_vm0, %v37_v21 }
  0x4a   :  { %449 = vmatmul.msk.f32.gmra.mxu0 %vm60_vm0, %v13_v22  ;;  %457 = vmatmul.msk.f32.gmra.mxu1 %vm60_vm0, %v21_v23 }
  0x51   :  { %466 = vmatmul.msk.f32.gmra.mxu2 %vm60_vm0, %v30_v24  ;;  %474 = vmatmul.msk.f32.gmra.mxu3 %vm60_vm0, %v38_v25 }
  0x52   :  { %450 = vmatmul.msk.f32.gmra.mxu0 %vm60_vm0, %v14_v26  ;;  %458 = vmatmul.msk.f32.gmra.mxu1 %vm60_vm0, %v22_v27 }
  0x59   :  { %467 = vmatmul.msk.f32.gmra.mxu2 %vm60_vm0, %v31_v28  ;;  %475 = vmatmul.msk.f32.gmra.mxu3 %vm60_vm0, %v39_v29 }
  0x5a   :  { %451 = vmatmul.msk.f32.gmra.mxu0 %vm60_vm0, %v15_v30  ;;  %459 = vmatmul.msk.f32.gmra.mxu1 %vm60_vm0, %v23_v31 }
  0x61   :  { %468 = vmatmul.msk.f32.gmra.mxu2 %vm60_vm0, %v32_v32  ;;  %476 = vmatmul.msk.f32.gmra.mxu3 %vm60_vm0, %v40_v33 }
  0x62   :  { %452 = vmatmul.msk.f32.gmra.mxu0 %vm60_vm0, %v16_v34  ;;  %460 = vmatmul.msk.f32.gmra.mxu1 %vm60_vm0, %v24_v35 }
  0x69   :  { %469 = vmatmul.msk.f32.gmra.mxu2 %vm60_vm0, %v33_v36  ;;  %477 = vmatmul.msk.f32.gmra.mxu3 %vm60_vm0, %v41_v37 }
  0x6a   :  { %453 = vmatmul.msk.f32.gmra.mxu0 %vm60_vm0, %v17_v38  ;;  %461 = vmatmul.msk.f32.gmra.mxu1 %vm60_vm0, %v25_v39 }
  0x71   :  { %470 = vmatmul.msk.f32.gmra.mxu2 %vm60_vm0, %v34_v40  ;;  %478 = vmatmul.msk.f32.gmra.mxu3 %vm60_vm0, %v42_v41 }
  0x72   :  { %454 = vmatmul.msk.f32.gmra.mxu0 %vm60_vm0, %v18_v42  ;;  %462 = vmatmul.msk.f32.gmra.mxu1 %vm60_vm0, %v26_v43 }
  0x79   :  { %471 = vmatmul.msk.f32.gmra.mxu2 %vm60_vm0, %v35_v44  ;;  %479 = vmatmul.msk.f32.gmra.mxu3 %vm60_vm0, %v43_v45 }
  0x7a   :  { %455 = vmatmul.msk.f32.gmra.mxu0 %vm60_vm0, %v19_v46  ;;  %463 = vmatmul.msk.f32.gmra.mxu1 %vm60_vm0, %v27_v47 }
  0xbf   :  { %v222_v48 = vpop.f32.mrf.mxu0  ;;  %v246_v49 = vpop.f32.mrf.mxu1 }
  0xc0   :  { %v318_v50 = vmin.f32 %v222_v48, 0.0  ;;  %v326_v51 = vmin.f32 %v246_v49, 0.0 }
  0xc2   :  { %531 = vpow2.f32 %v318_v50 }
  0xc3   :  { %533 = vpow2.f32 %v326_v51 }
  0xc4   :  { %v270_v52 = vpop.f32.mrf.mxu2  ;;  %v294_v53 = vpop.f32.mrf.mxu3 }
  0xc5   :  { %v334_v54 = vmin.f32 %v270_v52, 0.0  ;;  %v342_v55 = vmin.f32 %v294_v53, 0.0 }
  0xc7   :  { %535 = vpow2.f32 %v334_v54  ;;  %v225_v56 = vpop.f32.mrf.mxu0  ;;  %v249_v57 = vpop.f32.mrf.mxu1 }
  0xc8   :  { %v532_v58 = vpop.eup %531  ;;  %537 = vpow2.f32 %v342_v55  ;;  %v319_v59 = vmin.f32 %v225_v56, 0.0  ;;  %v327_v60 = vmin.f32 %v249_v57, 0.0 }
  0xc9   :  { %v534_v61 = vpop.eup %533  ;;  %382 = vst [vmem:[#allocation2] sm:$0xff] %v532_v58 }
  0xca   :  { %390 = vst [vmem:[#allocation2 + $0x40] sm:$0xff] %v534_v61  ;;  %539 = vpow2.f32 %v319_v59 }
  0xcb   :  { %541 = vpow2.f32 %v327_v60 }
  0xcc   :  { %v273_v62 = vpop.f32.mrf.mxu2  ;;  %v297_v63 = vpop.f32.mrf.mxu3 }
  0xcd   :  { %v536_v0 = vpop.eup %535  ;;  %v335_v1 = vmin.f32 %v273_v62, 0.0  ;;  %v343_v2 = vmin.f32 %v297_v63, 0.0 }
  0xce   :  { %v538_v3 = vpop.eup %537  ;;  %398 = vst [vmem:[#allocation2 + $0x80] sm:$0xff] %v536_v0 }
  0xcf   :  { %406 = vst [vmem:[#allocation2 + $0xc0] sm:$0xff] %v538_v3  ;;  %543 = vpow2.f32 %v335_v1  ;;  %v228_v4 = vpop.f32.mrf.mxu0  ;;  %v252_v5 = vpop.f32.mrf.mxu1 }
  0xd0   :  { %v540_v6 = vpop.eup %539  ;;  %545 = vpow2.f32 %v343_v2  ;;  %v320_v7 = vmin.f32 %v228_v4, 0.0  ;;  %v328_v8 = vmin.f32 %v252_v5, 0.0 }
  0xd1   :  { %v542_v9 = vpop.eup %541  ;;  %383 = vst [vmem:[#allocation2 + $0x8] sm:$0xff] %v540_v6 }
  0xd2   :  { %391 = vst [vmem:[#allocation2 + $0x48] sm:$0xff] %v542_v9  ;;  %547 = vpow2.f32 %v320_v7 }
  0xd3   :  { %549 = vpow2.f32 %v328_v8 }
  0xd4   :  { %v276_v10 = vpop.f32.mrf.mxu2  ;;  %v300_v11 = vpop.f32.mrf.mxu3 }
  0xd5   :  { %v544_v12 = vpop.eup %543  ;;  %v336_v13 = vmin.f32 %v276_v10, 0.0  ;;  %v344_v14 = vmin.f32 %v300_v11, 0.0 }
  0xd6   :  { %v546_v15 = vpop.eup %545  ;;  %399 = vst [vmem:[#allocation2 + $0x88] sm:$0xff] %v544_v12 }
  0xd7   :  { %407 = vst [vmem:[#allocation2 + $0xc8] sm:$0xff] %v546_v15  ;;  %551 = vpow2.f32 %v336_v13  ;;  %v231_v16 = vpop.f32.mrf.mxu0  ;;  %v255_v17 = vpop.f32.mrf.mxu1 }
  0xd8   :  { %v548_v18 = vpop.eup %547  ;;  %553 = vpow2.f32 %v344_v14  ;;  %v321_v19 = vmin.f32 %v231_v16, 0.0  ;;  %v329_v20 = vmin.f32 %v255_v17, 0.0 }
  0xd9   :  { %v550_v21 = vpop.eup %549  ;;  %384 = vst [vmem:[#allocation2 + $0x10] sm:$0xff] %v548_v18 }
  0xda   :  { %392 = vst [vmem:[#allocation2 + $0x50] sm:$0xff] %v550_v21  ;;  %555 = vpow2.f32 %v321_v19 }
  0xdb   :  { %557 = vpow2.f32 %v329_v20 }
  0xdc   :  { %v279_v22 = vpop.f32.mrf.mxu2  ;;  %v303_v23 = vpop.f32.mrf.mxu3 }
  0xdd   :  { %v552_v24 = vpop.eup %551  ;;  %v337_v25 = vmin.f32 %v279_v22, 0.0  ;;  %v345_v26 = vmin.f32 %v303_v23, 0.0 }
  0xde   :  { %v554_v27 = vpop.eup %553  ;;  %400 = vst [vmem:[#allocation2 + $0x90] sm:$0xff] %v552_v24 }
  0xdf   :  { %408 = vst [vmem:[#allocation2 + $0xd0] sm:$0xff] %v554_v27  ;;  %559 = vpow2.f32 %v337_v25  ;;  %v234_v28 = vpop.f32.mrf.mxu0  ;;  %v258_v29 = vpop.f32.mrf.mxu1 }
  0xe0   :  { %v556_v30 = vpop.eup %555  ;;  %561 = vpow2.f32 %v345_v26  ;;  %v322_v31 = vmin.f32 %v234_v28, 0.0  ;;  %v330_v32 = vmin.f32 %v258_v29, 0.0 }
  0xe1   :  { %v558_v33 = vpop.eup %557  ;;  %385 = vst [vmem:[#allocation2 + $0x18] sm:$0xff] %v556_v30 }
  0xe2   :  { %393 = vst [vmem:[#allocation2 + $0x58] sm:$0xff] %v558_v33  ;;  %563 = vpow2.f32 %v322_v31 }
  0xe3   :  { %565 = vpow2.f32 %v330_v32 }
  0xe4   :  { %v282_v34 = vpop.f32.mrf.mxu2  ;;  %v306_v35 = vpop.f32.mrf.mxu3 }
  0xe5   :  { %v560_v36 = vpop.eup %559  ;;  %v338_v37 = vmin.f32 %v282_v34, 0.0  ;;  %v346_v38 = vmin.f32 %v306_v35, 0.0 }
  0xe6   :  { %v562_v39 = vpop.eup %561  ;;  %401 = vst [vmem:[#allocation2 + $0x98] sm:$0xff] %v560_v36 }
  0xe7   :  { %409 = vst [vmem:[#allocation2 + $0xd8] sm:$0xff] %v562_v39  ;;  %567 = vpow2.f32 %v338_v37  ;;  %v237_v40 = vpop.f32.mrf.mxu0  ;;  %v261_v41 = vpop.f32.mrf.mxu1 }
  0xe8   :  { %v564_v42 = vpop.eup %563  ;;  %569 = vpow2.f32 %v346_v38  ;;  %v323_v43 = vmin.f32 %v237_v40, 0.0  ;;  %v331_v44 = vmin.f32 %v261_v41, 0.0 }
  0xe9   :  { %v566_v45 = vpop.eup %565  ;;  %386 = vst [vmem:[#allocation2 + $0x20] sm:$0xff] %v564_v42 }
  0xea   :  { %394 = vst [vmem:[#allocation2 + $0x60] sm:$0xff] %v566_v45  ;;  %571 = vpow2.f32 %v323_v43 }
  0xeb   :  { %573 = vpow2.f32 %v331_v44 }
  0xec   :  { %v285_v46 = vpop.f32.mrf.mxu2  ;;  %v309_v47 = vpop.f32.mrf.mxu3 }
  0xed   :  { %v568_v48 = vpop.eup %567  ;;  %v339_v49 = vmin.f32 %v285_v46, 0.0  ;;  %v347_v50 = vmin.f32 %v309_v47, 0.0 }
  0xee   :  { %v570_v51 = vpop.eup %569  ;;  %402 = vst [vmem:[#allocation2 + $0xa0] sm:$0xff] %v568_v48 }
  0xef   :  { %410 = vst [vmem:[#allocation2 + $0xe0] sm:$0xff] %v570_v51  ;;  %575 = vpow2.f32 %v339_v49  ;;  %v240_v52 = vpop.f32.mrf.mxu0  ;;  %v264_v53 = vpop.f32.mrf.mxu1 }
  0xf0   :  { %v572_v54 = vpop.eup %571  ;;  %577 = vpow2.f32 %v347_v50  ;;  %v324_v55 = vmin.f32 %v240_v52, 0.0  ;;  %v332_v56 = vmin.f32 %v264_v53, 0.0 }
  0xf1   :  { %v574_v57 = vpop.eup %573  ;;  %387 = vst [vmem:[#allocation2 + $0x28] sm:$0xff] %v572_v54 }
  0xf2   :  { %395 = vst [vmem:[#allocation2 + $0x68] sm:$0xff] %v574_v57  ;;  %579 = vpow2.f32 %v324_v55 }
  0xf3   :  { %581 = vpow2.f32 %v332_v56 }
  0xf4   :  { %v288_v58 = vpop.f32.mrf.mxu2  ;;  %v312_v59 = vpop.f32.mrf.mxu3 }
  0xf5   :  { %v576_v60 = vpop.eup %575  ;;  %v340_v61 = vmin.f32 %v288_v58, 0.0  ;;  %v348_v62 = vmin.f32 %v312_v59, 0.0 }
  0xf6   :  { %v578_v63 = vpop.eup %577  ;;  %403 = vst [vmem:[#allocation2 + $0xa8] sm:$0xff] %v576_v60 }
  0xf7   :  { %411 = vst [vmem:[#allocation2 + $0xe8] sm:$0xff] %v578_v63  ;;  %583 = vpow2.f32 %v340_v61  ;;  %v243_v0 = vpop.f32.mrf.mxu0  ;;  %v267_v1 = vpop.f32.mrf.mxu1 }
  0xf8   :  { %v580_v2 = vpop.eup %579  ;;  %585 = vpow2.f32 %v348_v62  ;;  %v325_v3 = vmin.f32 %v243_v0, 0.0  ;;  %v333_v4 = vmin.f32 %v267_v1, 0.0 }
  0xf9   :  { %v582_v5 = vpop.eup %581  ;;  %388 = vst [vmem:[#allocation2 + $0x30] sm:$0xff] %v580_v2 }
  0xfa   :  { %396 = vst [vmem:[#allocation2 + $0x70] sm:$0xff] %v582_v5  ;;  %587 = vpow2.f32 %v325_v3 }
  0xfb   :  { %589 = vpow2.f32 %v333_v4 }
  0xfc   :  { %v291_v6 = vpop.f32.mrf.mxu2  ;;  %v315_v7 = vpop.f32.mrf.mxu3 }
  0xfd   :  { %v584_v8 = vpop.eup %583  ;;  %v341_v9 = vmin.f32 %v291_v6, 0.0  ;;  %v349_v10 = vmin.f32 %v315_v7, 0.0 }
  0xfe   :  { %v586_v11 = vpop.eup %585  ;;  %404 = vst [vmem:[#allocation2 + $0xb0] sm:$0xff] %v584_v8 }
  0xff   :  { %412 = vst [vmem:[#allocation2 + $0xf0] sm:$0xff] %v586_v11  ;;  %591 = vpow2.f32 %v341_v9 }
 0x100   :  { %v588_v12 = vpop.eup %587  ;;  %593 = vpow2.f32 %v349_v10 }
 0x101   :  { %v590_v13 = vpop.eup %589  ;;  %389 = vst [vmem:[#allocation2 + $0x38] sm:$0xff] %v588_v12 }
 0x102   :  { %397 = vst [vmem:[#allocation2 + $0x78] sm:$0xff] %v590_v13 }
 0x105   :  { %v592_v14 = vpop.eup %591 }
 0x106   :  { %v594_v15 = vpop.eup %593  ;;  %405 = vst [vmem:[#allocation2 + $0xb8] sm:$0xff] %v592_v14 }
 0x107   :  { %413 = vst [vmem:[#allocation2 + $0xf8] sm:$0xff] %v594_v15 }
 0x108   :  { %426 = dma.vmem_to_hbm [thread:$0]  %s419_s18, 4096, %s421_s21, [#allocation3], %s622_s22, %s622_s22, %s623_s23  }
 0x109   :  { %619 = dma.done.wait [#allocation3], 4096  }
 0x10a   :  { %620 = vsyncadd [#allocation3], 4294963200 }
 0x10b   :  { %431 = vsyncpa [#allocation3], 1 }

</bundles_post_ra>
